<compile_context>
chip_gen: v7x
topology: tpu7x:2x2x1
jax: 0.10.0
libtpu: 0.0.40
codegen_flags: <defaults>
</compile_context>

<pallas_src>
import functools

import jax
import jax.numpy as jnp
from jax.experimental import pallas as pl
from jax.experimental.pallas import tpu as pltpu

SEED_UNIFORM = "seed_uniform"
SEED_WEIGHTED = "seed_weighted"

LANE = 512        # lane-dense last dim (multiple of 128)
ROW_CAP = 1024    # max block rows -> 1024*512*4 B = 2 MiB per array per buffer
NEG = -1e30       # sentinel for non-candidate / padded keys (< any real key)


def _round_up(x, m):
    return ((x + m - 1) // m) * m


def _sbg_select_kernel(thr_ref, cut_ref, keys_ref, bg_ref, out_ref):
    """out = where(selected, 1.0, bg) for one (block_rows, LANE) tile."""
    key_thr = thr_ref[0]                  # k-th largest perturbed log-prob (f32)
    cut_key = cut_ref[0]                  # flat-index cutoff for threshold ties
    blk_rows, lanes = keys_ref.shape      # static block shape
    i = pl.program_id(0)

    # Flat index of every element in the padded slab (padding is at the end,
    # so real elements keep their original flat index).
    row = jax.lax.broadcasted_iota(jnp.int32, (blk_rows, lanes), 0)
    col = jax.lax.broadcasted_iota(jnp.int32, (blk_rows, lanes), 1)
    flat_idx = (i * blk_rows + row) * lanes + col

    keys = keys_ref[...]
    sel = (keys > key_thr) | ((keys == key_thr) & (flat_idx < cut_key))
    out_ref[...] = jnp.where(sel, jnp.float32(1.0), bg_ref[...])


@functools.partial(jax.jit, static_argnames=("n", "k", "weighted"))
def _sbg_impl(cam, bg, key, *, n, k, weighted):
    h, w = cam.shape
    N = h * w
    f32 = jnp.float32

    # ---- wrapper-side scalar work: candidate mask, keys, thresholds ----
    c = cam.reshape(N).astype(f32) + f32(1e-8)               # PyTorch _cam
    g = jax.random.gumbel(key, (N,), dtype=f32)
    if weighted:
        # PyTorch: probs = relu(1 - _cam) + 1e-8  (_cam already carries +1e-8)
        pert = jnp.log(jnp.maximum(f32(1.0) - c, f32(0.0)) + f32(1e-8)) + g
    else:
        pert = g                                             # uniform probs

    idx = jnp.arange(N, dtype=jnp.int32)

    # n-th smallest of (cam + eps) via one top_k (no full O(N log^2 N) sort).
    v_thr = -jax.lax.top_k(-c, n)[0][n - 1]
    less = c < v_thr
    eq = c == v_thr
    eq_i = eq.astype(jnp.int32)
    need_eq = jnp.int32(n) - jnp.sum(less.astype(jnp.int32))
    prefix_eq = jnp.cumsum(eq_i) - eq_i                      # ties strictly before
    cand = less | (eq & (prefix_eq < need_eq))               # stable tie-break

    keys = jnp.where(cand, pert, f32(NEG))

    # k-th largest perturbed key among candidates + flat-index tie cutoff.
    # (k <= n <= #candidates, so key_thr is always a real candidate key > NEG.)
    key_thr = jax.lax.top_k(keys, k)[0][k - 1]
    keq = keys == key_thr
    keq_i = keq.astype(jnp.int32)
    need_eq_k = jnp.int32(k) - jnp.sum((keys > key_thr).astype(jnp.int32))
    prefix_keq = jnp.cumsum(keq_i) - keq_i
    take_tie = keq & (prefix_keq < need_eq_k)
    # selected <=> keys > key_thr  OR  (keys == key_thr AND flat_idx < cut_key)
    cut_key = jnp.max(jnp.where(take_tie, idx, jnp.int32(-1))) + jnp.int32(1)

    # ---- layout: lane-dense 2-D slab (rows, LANE), large (block_rows, LANE) tiles ----
    rows = -(-N // LANE)
    rows8 = _round_up(rows, 8)
    if rows8 <= 16:
        block_rows = rows8                                   # tiny inputs: one step
    else:
        # Large blocks for bandwidth; keep >=2 grid steps (v7x has 2 TCs),
        # cap per-buffer size for v7x's smaller VMEM.
        block_rows = min(ROW_CAP, _round_up(-(-rows8 // 2), 8))
    num_blocks = -(-rows8 // block_rows)
    rows_padded = num_blocks * block_rows
    Npad = rows_padded * LANE
    pad = Npad - N

    bg_flat = bg.reshape(N).astype(f32)
    if pad:
        # Padded keys get NEG (never selected); padded bg values are sliced off.
        keys = jnp.pad(keys, (0, pad), constant_values=NEG)
        bg_flat = jnp.pad(bg_flat, (0, pad))
    keys2 = keys.reshape(rows_padded, LANE)
    bg2 = bg_flat.reshape(rows_padded, LANE)

    thr = key_thr.reshape(1).astype(f32)
    cut = cut_key.reshape(1).astype(jnp.int32)

    out = pl.pallas_call(
        _sbg_select_kernel,
        out_shape=jax.ShapeDtypeStruct((rows_padded, LANE), f32),
        grid=(num_blocks,),
        in_specs=[
            pl.BlockSpec(memory_space=pltpu.MemorySpace.SMEM),     # key_thr (1,)
            pl.BlockSpec(memory_space=pltpu.MemorySpace.SMEM),     # cut_key (1,)
            pl.BlockSpec((block_rows, LANE), lambda i: (i, 0)),    # keys tile
            pl.BlockSpec((block_rows, LANE), lambda i: (i, 0)),    # bg tile
        ],
        out_specs=pl.BlockSpec((block_rows, LANE), lambda i: (i, 0)),
        input_output_aliases={3: 0},                               # bg aliased to out
        compiler_params=pltpu.CompilerParams(
            dimension_semantics=("parallel",),
            vmem_limit_bytes=32 * 1024 * 1024,
        ),
    )(thr, cut, keys2, bg2)

    out_flat = out.reshape(Npad)
    if pad:
        out_flat = out_flat[:N]
    return out_flat.reshape(h, w).astype(bg.dtype)


def sbg_forward(cam, bg, *, min_p, min_, seed_tech, key):
    """JAX/Pallas equivalent of _SBG(min_p, min_, seed_tech).forward(cam, bg)."""
    assert cam.ndim == 2 and bg.shape == cam.shape
    h, w = cam.shape
    n = min(int(min_p * h * w), h * w)
    if n <= 0 or min_ <= 0:                  # static short-circuit, like PyTorch
        return bg
    k = min(min_, n)
    if seed_tech == SEED_UNIFORM:
        weighted = False
    elif seed_tech == SEED_WEIGHTED:
        weighted = True
    else:
        raise NotImplementedError(seed_tech)
    return _sbg_impl(cam, bg, key, n=n, k=k, weighted=weighted)


def _sbg_reference(cam, bg, *, min_p, min_, seed_tech, key):
    """Pure-JAX reference with identical semantics (stable argsort + Gumbel-top-k)."""
    h, w = cam.shape
    N = h * w
    n = int(min_p * h * w)
    if n <= 0 or min_ <= 0:
        return bg
    k = min(min_, n)
    c = cam.reshape(N).astype(jnp.float32) + jnp.float32(1e-8)
    cand_idx = jnp.argsort(c, stable=True)[:n]
    g = jax.random.gumbel(key, (N,), dtype=jnp.float32)
    if seed_tech == SEED_WEIGHTED:
        pert = jnp.log(jnp.maximum(1.0 - c, 0.0) + jnp.float32(1e-8)) + g
    else:
        pert = g
    sel = cand_idx[jax.lax.top_k(pert[cand_idx], k)[1]]
    out = bg.reshape(N).astype(jnp.float32).at[sel].set(1.0)
    return out.reshape(h, w)


if __name__ == "__main__":
    key = jax.random.PRNGKey(0)
    kcam, kg = jax.random.split(key, 2)

    h, w = 16, 16
    min_p, min_ = 0.2, 10

    cam = jax.random.uniform(kcam, (h, w), dtype=jnp.float32)   # CAM in [0, 1)
    bg = jnp.zeros((h, w), dtype=jnp.float32)

    n = int(min_p * h * w)
    k = min(min_, n)
    thresh = jnp.sort((cam + 1e-8).reshape(-1))[n - 1]

    for seed_tech in (SEED_WEIGHTED, SEED_UNIFORM):
        out = sbg_forward(cam, bg, min_p=min_p, min_=min_,
                          seed_tech=seed_tech, key=kg)
        out = jax.block_until_ready(out)

        # Exactly min(min_, n) pixels set, all among the n smallest CAM values,
        # and the selected set matches the pure-JAX reference.
        num_set = int(jnp.sum(out))
        assert num_set == k, (seed_tech, num_set, k)
        assert bool(jnp.all(jnp.where(out == 1.0, cam + 1e-8, -jnp.inf) <= thresh))
        ref = _sbg_reference(cam, bg, min_p=min_p, min_=min_,
                             seed_tech=seed_tech, key=kg)
        assert bool(jnp.array_equal(out, ref)), seed_tech

    print("KERNEL_OK")
</pallas_src>

<mosaic_0001>
module attributes {stable_mosaic.version = 11 : i64} {
  func.func @_sbg_select_kernel(%arg0: i32, %arg1: memref<1xf32, #tpu.memory_space<smem>>, %arg2: memref<1xi32, #tpu.memory_space<smem>>, %arg3: memref<8x512xf32, #tpu.memory_space<vmem>>, %arg4: memref<8x512xf32, #tpu.memory_space<vmem>>, %arg5: memref<8x512xf32, #tpu.memory_space<vmem>>) attributes {dimension_semantics = [#tpu.dimension_semantics<parallel>], iteration_bounds = array<i64: 1>, scalar_prefetch = 0 : i64, scratch_operands = 0 : i64, tpu.core_type = #tpu.core_type<tc>, window_params = [{transform_indices = @transform_0, window_bounds = array<i64: 1>}, {transform_indices = @transform_1, window_bounds = array<i64: 1>}, {transform_indices = @transform_2, window_bounds = array<i64: 8, 512>}, {transform_indices = @transform_3, window_bounds = array<i64: 8, 512>}, {transform_indices = @transform_4, window_bounds = array<i64: 8, 512>}]} {
    %c0 = arith.constant 0 : index
    %0 = memref.load %arg1[%c0] : memref<1xf32, #tpu.memory_space<smem>>
    %c0_0 = arith.constant 0 : index
    %1 = memref.load %arg2[%c0_0] : memref<1xi32, #tpu.memory_space<smem>>
    %2 = tpu.iota {dimensions = array<i32: 0>} : vector<8x512xi32>
    %3 = tpu.iota {dimensions = array<i32: 1>} : vector<8x512xi32>
    %c8_i32 = arith.constant 8 : i32
    %4 = arith.muli %arg0, %c8_i32 : i32
    %5 = vector.broadcast %4 : i32 to vector<8x512xi32>
    %6 = arith.addi %5, %2 : vector<8x512xi32>
    %c512_i32 = arith.constant 512 : i32
    %7 = vector.broadcast %c512_i32 : i32 to vector<8x512xi32>
    %8 = arith.muli %6, %7 : vector<8x512xi32>
    %9 = arith.addi %8, %3 : vector<8x512xi32>
    %c0_1 = arith.constant 0 : index
    %c0_2 = arith.constant 0 : index
    %10 = vector.load %arg3[%c0_1, %c0_2] : memref<8x512xf32, #tpu.memory_space<vmem>>, vector<8x512xf32>
    %11 = vector.broadcast %0 : f32 to vector<8x512xf32>
    %12 = arith.cmpf ogt, %10, %11 : vector<8x512xf32>
    %13 = vector.broadcast %0 : f32 to vector<8x512xf32>
    %14 = arith.cmpf oeq, %10, %13 : vector<8x512xf32>
    %15 = vector.broadcast %1 : i32 to vector<8x512xi32>
    %16 = arith.cmpi slt, %9, %15 : vector<8x512xi32>
    %17 = arith.andi %14, %16 : vector<8x512xi1>
    %18 = arith.ori %12, %17 : vector<8x512xi1>
    %c0_3 = arith.constant 0 : index
    %c0_4 = arith.constant 0 : index
    %19 = vector.load %arg4[%c0_3, %c0_4] : memref<8x512xf32, #tpu.memory_space<vmem>>, vector<8x512xf32>
    %cst = arith.constant 1.000000e+00 : f32
    %20 = vector.broadcast %cst : f32 to vector<8x512xf32>
    %21 = arith.select %18, %20, %19 : vector<8x512xi1>, vector<8x512xf32>
    %c0_5 = arith.constant 0 : index
    %c0_6 = arith.constant 0 : index
    %22 = vector.load %arg5[%c0_5, %c0_6] : memref<8x512xf32, #tpu.memory_space<vmem>>, vector<8x512xf32>
    tpu.vector_store %arg5[%c0_5, %c0_6], %21 {strides = array<i32>} : memref<8x512xf32, #tpu.memory_space<vmem>>, vector<8x512xf32>,
    return
  }
  func.func @transform_0(%arg0: i32) -> i32 {
    %c0_i32 = arith.constant 0 : i32
    %c0_i32_0 = arith.constant 0 : i32
    return %c0_i32 : i32
  }
  func.func @transform_1(%arg0: i32) -> i32 {
    %c0_i32 = arith.constant 0 : i32
    %c0_i32_0 = arith.constant 0 : i32
    return %c0_i32 : i32
  }
  func.func @transform_2(%arg0: i32) -> (i32, i32) {
    %c0_i32 = arith.constant 0 : i32
    %c0_i32_0 = arith.constant 0 : i32
    return %arg0, %c0_i32 : i32, i32
  }
  func.func @transform_3(%arg0: i32) -> (i32, i32) {
    %c0_i32 = arith.constant 0 : i32
    %c0_i32_0 = arith.constant 0 : i32
    return %arg0, %c0_i32 : i32, i32
  }
  func.func @transform_4(%arg0: i32) -> (i32, i32) {
    %c0_i32 = arith.constant 0 : i32
    %c0_i32_0 = arith.constant 0 : i32
    return %arg0, %c0_i32 : i32, i32
  }
}

</mosaic_0001>

<bundles_post_ra>
// kernel: _sbg_impl.1
= control target key start
LH: loop header
LB: loop body
LE: loop exit
PB: predicated region body
PF: predicated region fallthrough
CT: control target
= control target key end

     0   :  { %v21_v0 = vlaneseq  ;;  %s145_s0 = inlined_call_operand.<no memory space> [shape: f32[1], index: 0, kind: input, shape index: {}]   ;;  %s146_s2 = inlined_call_operand.vmem [shape: f32[8,512], index: 2, kind: input, shape index: {}]   ;;  %s147_s1 = inlined_call_operand.<no memory space> [shape: s32[1], index: 1, kind: input, shape index: {}]   ;;  %s148_s3 = inlined_call_operand.vmem [shape: f32[8,512], index: 3, kind: input, shape index: {}, may-alias: {3,4}]   ;;  %s149_s4 = inlined_call_operand.vmem [shape: f32[8,512], index: 4, kind: output, shape index: {}, may-alias: {3,4}]  }
   0x1   :  { %v36_v3 = vld [vmem:[%s146_s2] sm:$0xff]  ;;  %v40_v4 = vstv %s145_s0  ;;  %v49_v9 = vstv %s147_s1  ;;  %v37_v10 = vld [vmem:[%s146_s2 + $0x8] sm:$0xff] }
   0x2   :  { %v22_v1 = vshrl.u32 %v21_v0, 7  ;;  %v24_v2 = vand.u32 127, %v21_v0  ;;  %vm45_vm0 = vcmp.eq.f32.partialorder %v36_v3, %v40_v4  ;;  %vm41_vm1 = vcmp.gt.f32.partialorder %v36_v3, %v40_v4  ;;  %v38_v14 = vld [vmem:[%s146_s2 + $0x10] sm:$0xff]  ;;  %v62_v15 = vld [vmem:[%s148_s3] sm:$0xff]  ;;  %v39_v17 = vld [vmem:[%s146_s2 + $0x18] sm:$0xff] }
   0x3   :  { %vm46_vm3 = vcmp.eq.f32.partialorder %v37_v10, %v40_v4  ;;  %vm42_vm6 = vcmp.gt.f32.partialorder %v37_v10, %v40_v4  ;;  %v63_v18 = vld [vmem:[%s148_s3 + $0x8] sm:$0xff]  ;;  %vm47_vm8 = vcmp.eq.f32.partialorder %v38_v14, %v40_v4  ;;  %vm43_vm11 = vcmp.gt.f32.partialorder %v38_v14, %v40_v4 }
   0x4   :  { %v31_v5 = vmul.u32 512, %v22_v1  ;;  %v25_v6 = vadd.s32 128, %v24_v2  ;;  %v26_v7 = vadd.s32 256, %v24_v2  ;;  %v27_v8 = vadd.s32 384, %v24_v2 }
   0x5   :  { %vm48_vm13 = vcmp.eq.f32.partialorder %v39_v17, %v40_v4 }
   0x6   :  { %v32_v11 = vadd.s32 %v31_v5, %v24_v2  ;;  %v33_v12 = vadd.s32 %v31_v5, %v25_v6  ;;  %v34_v13 = vadd.s32 %v31_v5, %v26_v7  ;;  %v35_v16 = vadd.s32 %v31_v5, %v27_v8 }
   0x8   :  { %vm50_vm2 = vcmp.lt.s32.totalorder %v32_v11, %v49_v9  ;;  %vm51_vm4 = vcmp.lt.s32.totalorder %v33_v12, %v49_v9  ;;  %vm52_vm9 = vcmp.lt.s32.totalorder %v34_v13, %v49_v9  ;;  %vm53_vm14 = vcmp.lt.s32.totalorder %v35_v16, %v49_v9 }
   0x9   :  { %vm54_vm5 = vmand %vm45_vm0, %vm50_vm2  ;;  %vm44_vm0 = vcmp.gt.f32.partialorder %v39_v17, %v40_v4 }
   0xa   :  { %vm58_vm7 = vmor %vm41_vm1, %vm54_vm5 }
   0xb   :  { %v66_v19 = vsel %vm58_vm7, 1.0, %v62_v15  ;;  %vm55_vm10 = vmand %vm46_vm3, %vm51_vm4 }
   0xc   :  { %70 = vst [vmem:[%s149_s4] sm:$0xff] %v66_v19  ;;  %vm59_vm12 = vmor %vm42_vm6, %vm55_vm10 }
   0xd   :  { %v67_v21 = vsel %vm59_vm12, 1.0, %v63_v18  ;;  %vm56_vm15 = vmand %vm47_vm8, %vm52_vm9 }
   0xe   :  { %vm60_vm1 = vmor %vm43_vm11, %vm56_vm15 }
   0xf   :  { %vm57_vm2 = vmand %vm48_vm13, %vm53_vm14 }
  0x10   :  { %vm61_vm3 = vmor %vm44_vm0, %vm57_vm2 }
  0x13   :  { %v64_v20 = vld [vmem:[%s148_s3 + $0x10] sm:$0xff] }
  0x14   :  { %71 = vst [vmem:[%s149_s4 + $0x8] sm:$0xff] %v67_v21  ;;  %v68_v23 = vsel %vm60_vm1, 1.0, %v64_v20 }
  0x1b   :  { %v65_v22 = vld [vmem:[%s148_s3 + $0x18] sm:$0xff] }
  0x1c   :  { %72 = vst [vmem:[%s149_s4 + $0x10] sm:$0xff] %v68_v23  ;;  %v69_v24 = vsel %vm61_vm3, 1.0, %v65_v22 }
  0x1d   :  { %73 = vst [vmem:[%s149_s4 + $0x18] sm:$0xff] %v69_v24 }

</bundles_post_ra>
